<compile_context>
chip_gen: v7x
topology: tpu7x:2x2x1
jax: 0.10.0
libtpu: 0.0.40
codegen_flags: <defaults>
</compile_context>

<pallas_src>
import functools

import jax
import jax.numpy as jnp
from jax.experimental import pallas as pl
from jax.experimental.pallas import tpu as pltpu


def _round_up(n: int, m: int) -> int:
    return ((n + m - 1) // m) * m


def _swish(v, beta):
    """v * sigmoid(beta * v) with sigmoid(z) = 0.5*tanh(0.5*z) + 0.5 (single EUP op)."""
    sig = 0.5 * jnp.tanh(0.5 * (beta * v)) + 0.5
    return v * sig


def _residual_block_kernel(xt_ref, pk_ref, p2_ref, wf_ref, w2_ref, o_ref, *, dh, dh_p):
    # xt holds x in lanes [0, dh) and t packed into lanes [dh, dh+dt); rest zero.
    xt = xt_ref[...]                                   # (TB, K_p) f32

    # Packed per-feature parameters — static row slices are free.
    ln_g   = pk_ref[0:1, :]
    ln_b   = pk_ref[1:2, :]
    beta1  = pk_ref[2:3, :]
    x_mask = pk_ref[3:4, :]                            # 1.0 on x's true lanes
    t_mask = pk_ref[4:5, :]                            # 1.0 on t's packed lanes
    beta3  = pk_ref[5:6, 0:dh_p]
    b2     = pk_ref[6:7, 0:dh_p]
    beta2  = p2_ref[0:1, :]
    bias_f = p2_ref[1:2, :]                            # b1 + bt (fused bias)

    # ---- net1: LayerNorm(dh) over x's true lanes only (t / padding masked) ----
    inv_dh = 1.0 / dh
    xm = xt * x_mask
    mu = jnp.sum(xm, axis=-1, keepdims=True) * inv_dh
    xc = (xm - mu) * x_mask
    var = jnp.sum(xc * xc, axis=-1, keepdims=True) * inv_dh
    h = xc * jax.lax.rsqrt(var + 1e-5) * ln_g + ln_b   # zero on non-x lanes (g,b padded 0)

    # ---- Swish(dh) ----
    h = _swish(h, beta1)

    # ---- fused Linear(dh,2dh)(h) + Linear(dt,2dh)(t): one K=K_p MXU matmul ----
    hk = h + xt * t_mask                               # re-inject t into its packed lanes
    z = jnp.dot(hk.astype(wf_ref.dtype), wf_ref[...],
                preferred_element_type=jnp.float32) + bias_f

    # ---- net2: Swish(2dh) -> Linear(2dh, dh) -> Swish(dh) ----
    z = _swish(z, beta2)
    y = jnp.dot(z.astype(w2_ref.dtype), w2_ref[...],
                preferred_element_type=jnp.float32) + b2
    y = _swish(y, beta3)

    # ---- residual (f32) ----
    o_ref[...] = (y + xt[:, 0:dh_p]).astype(o_ref.dtype)


def prepack_params(params, dh, dt, mxu_dtype=jnp.bfloat16):
    """One-time packing/padding of all parameters (call once, reuse every step)."""
    f32 = jnp.float32
    d2 = 2 * dh
    K_p = _round_up(dh + dt, 128)       # fused-matmul K: x lanes + t packed lanes
    dh_p = _round_up(dh, 128)
    d2_p = _round_up(d2, 128)

    def row(v, n, n_p):
        return jnp.pad(jnp.asarray(v, f32).reshape(-1), (0, n_p - n))

    x_mask = jnp.pad(jnp.ones((dh,), f32), (0, K_p - dh))
    t_mask = jnp.zeros((K_p,), f32).at[dh:dh + dt].set(1.0)

    p_k = jnp.stack([
        row(params["ln_g"], dh, K_p),
        row(params["ln_b"], dh, K_p),
        row(params["sw1_beta"], dh, K_p),
        x_mask,
        t_mask,
        row(params["sw3_beta"], dh, K_p),
        row(params["b2"], dh, K_p),
    ])                                                 # (7, K_p)
    p_2 = jnp.stack([
        row(params["sw2_beta"], d2, d2_p),
        row(params["b1"] + params["bt"], d2, d2_p),    # fused bias
    ])                                                 # (2, d2_p)

    # Fused [w1 ; wt] with wt's rows at x's packed t lanes; zero padding elsewhere.
    wf = jnp.zeros((K_p, d2_p), f32)
    wf = wf.at[:dh, :d2].set(jnp.asarray(params["w1"], f32))
    wf = wf.at[dh:dh + dt, :d2].set(jnp.asarray(params["wt"], f32))
    w2 = jnp.zeros((d2_p, dh_p), f32).at[:d2, :dh].set(jnp.asarray(params["w2"], f32))

    return {
        "p_k": p_k,
        "p_2": p_2,
        "wf": wf.astype(mxu_dtype),                    # bf16 by default (native MXU dtype)
        "w2": w2.astype(mxu_dtype),
    }


@jax.jit
def residual_block(x, t, packed):
    B, dh = x.shape
    dt = t.shape[1]
    f32 = jnp.float32

    K_p, d2_p = packed["wf"].shape
    dh_p = packed["w2"].shape[1]
    w_itemsize = packed["wf"].dtype.itemsize

    # Batch tiling: >= 2 grid steps so the "parallel" axis shards across both
    # v7x TensorCores; cap at 256 rows/tile (sweep 128 on v5e).
    TILE_CAP = 256
    num_tiles = max(2, pl.cdiv(B, TILE_CAP))
    tile_b = _round_up(pl.cdiv(B, num_tiles), 8)
    b_p = tile_b * num_tiles

    # Lane-dense activation slab: x in [0,dh), t packed into [dh, dh+dt).
    xt = jnp.zeros((b_p, K_p), f32)
    xt = xt.at[:B, :dh].set(x.astype(f32))
    xt = xt.at[:B, dh:dh + dt].set(t.astype(f32))

    # Explicit scoped-VMEM limit from the actual resident-buffer sum
    # (defaults are 16/32 MiB and would force spills long before physical VMEM).
    resident = (
        (K_p * d2_p + d2_p * dh_p) * w_itemsize        # single-buffered weights
        + (7 * K_p + 2 * d2_p) * 4                     # single-buffered packed params
        + 2 * tile_b * (K_p + dh_p) * 4                # double-buffered in/out tiles
    )
    vmem_limit = min(100 << 20, max(32 << 20, int(resident * 1.25) + (2 << 20)))

    flops = 2 * b_p * K_p * d2_p + 2 * b_p * d2_p * dh_p
    transcendentals = b_p * (K_p + d2_p + dh_p)        # one tanh per Swish element
    bytes_accessed = (
        b_p * K_p * 4 + b_p * dh_p * x.dtype.itemsize
        + (K_p * d2_p + d2_p * dh_p) * w_itemsize
        + (7 * K_p + 2 * d2_p) * 4
    )

    kernel = functools.partial(_residual_block_kernel, dh=dh, dh_p=dh_p)
    const = lambda i: (0, 0)                           # grid-invariant blocks

    out = pl.pallas_call(
        kernel,
        out_shape=jax.ShapeDtypeStruct((b_p, dh_p), x.dtype),
        grid=(num_tiles,),
        in_specs=[
            pl.BlockSpec((tile_b, K_p), lambda i: (i, 0)),                       # x|t tile
            pl.BlockSpec((7, K_p), const, pipeline_mode=pl.Buffered(1)),         # params (dh-wide)
            pl.BlockSpec((2, d2_p), const, pipeline_mode=pl.Buffered(1)),        # params (2dh-wide)
            pl.BlockSpec((K_p, d2_p), const, pipeline_mode=pl.Buffered(1)),      # fused [w1; wt]
            pl.BlockSpec((d2_p, dh_p), const, pipeline_mode=pl.Buffered(1)),     # w2
        ],
        out_specs=pl.BlockSpec((tile_b, dh_p), lambda i: (i, 0)),
        compiler_params=pltpu.CompilerParams(
            dimension_semantics=("parallel",),         # batch axis -> both v7x TCs
            vmem_limit_bytes=vmem_limit,
        ),
        cost_estimate=pl.CostEstimate(
            flops=flops,
            transcendentals=transcendentals,
            bytes_accessed=bytes_accessed,
        ),
    )(xt, packed["p_k"], packed["p_2"], packed["wf"], packed["w2"])

    return out[:B, :dh]


def init_params(key, dh, dt):
    ks = jax.random.split(key, 8)
    scale = 0.1
    return {
        "ln_g": jnp.ones((1, dh), jnp.float32),
        "ln_b": jnp.zeros((1, dh), jnp.float32),
        "sw1_beta": jnp.ones((1, dh), jnp.float32)
        + scale * jax.random.normal(ks[0], (1, dh), jnp.float32),
        "sw2_beta": jnp.ones((1, 2 * dh), jnp.float32)
        + scale * jax.random.normal(ks[1], (1, 2 * dh), jnp.float32),
        "sw3_beta": jnp.ones((1, dh), jnp.float32)
        + scale * jax.random.normal(ks[2], (1, dh), jnp.float32),
        "w1": scale * jax.random.normal(ks[3], (dh, 2 * dh), jnp.float32),
        "b1": scale * jax.random.normal(ks[4], (1, 2 * dh), jnp.float32),
        "wt": scale * jax.random.normal(ks[5], (dt, 2 * dh), jnp.float32),
        "bt": scale * jax.random.normal(ks[6], (1, 2 * dh), jnp.float32),
        "w2": scale * jax.random.normal(ks[7], (2 * dh, dh), jnp.float32),
        "b2": jnp.zeros((1, dh), jnp.float32),
    }


def residual_block_ref(x, t, p):
    """Pure-JAX reference matching the PyTorch forward exactly (f32 everywhere)."""
    mu = jnp.mean(x, axis=-1, keepdims=True)
    var = jnp.mean((x - mu) ** 2, axis=-1, keepdims=True)
    h = (x - mu) / jnp.sqrt(var + 1e-5) * p["ln_g"] + p["ln_b"]
    h = h * jax.nn.sigmoid(p["sw1_beta"] * h)
    h = h @ p["w1"] + p["b1"]
    ht = t @ p["wt"] + p["bt"]
    z = h + ht
    z = z * jax.nn.sigmoid(p["sw2_beta"] * z)
    y = z @ p["w2"] + p["b2"]
    y = y * jax.nn.sigmoid(p["sw3_beta"] * y)
    return y + x


if __name__ == "__main__":
    B, dh, dt = 8, 32, 16
    key = jax.random.PRNGKey(0)
    kx, kt, kp = jax.random.split(key, 3)

    x = jax.random.normal(kx, (B, dh), jnp.float32)
    t = jax.random.normal(kt, (B, dt), jnp.float32)
    params = init_params(kp, dh, dt)
    ref = residual_block_ref(x, t, params)

    # 1) f32 MXU path: tight agreement with the reference.
    packed_f32 = prepack_params(params, dh, dt, mxu_dtype=jnp.float32)
    out_f32 = jax.block_until_ready(residual_block(x, t, packed_f32))
    assert out_f32.shape == (B, dh)
    err_f32 = float(jnp.max(jnp.abs(out_f32 - ref)))
    assert jnp.allclose(out_f32, ref, atol=1e-4, rtol=1e-4), err_f32

    # 2) bf16 MXU path (production config): bf16 operand rounding -> looser tolerance.
    packed_bf16 = prepack_params(params, dh, dt)  # default bf16
    out_bf16 = jax.block_until_ready(residual_block(x, t, packed_bf16))
    err_bf16 = float(jnp.max(jnp.abs(out_bf16 - ref)))
    assert jnp.allclose(out_bf16, ref, atol=3e-2, rtol=3e-2), err_bf16

    print("KERNEL_OK")
</pallas_src>

<mosaic_0001>
module attributes {stable_mosaic.version = 11 : i64} {
  func.func @_residual_block_kernel(%arg0: i32, %arg1: memref<8x128xf32, #tpu.memory_space<vmem>>, %arg2: memref<7x128xf32, #tpu.memory_space<vmem>>, %arg3: memref<2x128xf32, #tpu.memory_space<vmem>>, %arg4: memref<128x128xf32, #tpu.memory_space<vmem>>, %arg5: memref<128x128xf32, #tpu.memory_space<vmem>>, %arg6: memref<8x128xf32, #tpu.memory_space<vmem>>) attributes {dimension_semantics = [#tpu.dimension_semantics<parallel>], iteration_bounds = array<i64: 2>, scalar_prefetch = 0 : i64, scratch_operands = 0 : i64, tpu.core_type = #tpu.core_type<tc>, window_params = [{transform_indices = @transform_0, window_bounds = array<i64: 8, 128>}, {pipeline_mode = #tpu.pipeline_mode<synchronous>, transform_indices = @transform_1, window_bounds = array<i64: 7, 128>}, {pipeline_mode = #tpu.pipeline_mode<synchronous>, transform_indices = @transform_2, window_bounds = array<i64: 2, 128>}, {pipeline_mode = #tpu.pipeline_mode<synchronous>, transform_indices = @transform_3, window_bounds = array<i64: 128, 128>}, {pipeline_mode = #tpu.pipeline_mode<synchronous>, transform_indices = @transform_4, window_bounds = array<i64: 128, 128>}, {transform_indices = @transform_5, window_bounds = array<i64: 8, 128>}]} {
    %c0 = arith.constant 0 : index
    %c0_0 = arith.constant 0 : index
    %0 = vector.load %arg1[%c0, %c0_0] : memref<8x128xf32, #tpu.memory_space<vmem>>, vector<8x128xf32>
    %c0_1 = arith.constant 0 : index
    %c0_2 = arith.constant 0 : index
    %1 = vector.load %arg2[%c0_1, %c0_2] : memref<7x128xf32, #tpu.memory_space<vmem>>, vector<1x128xf32>
    %c1 = arith.constant 1 : index
    %c0_3 = arith.constant 0 : index
    %2 = vector.load %arg2[%c1, %c0_3] : memref<7x128xf32, #tpu.memory_space<vmem>>, vector<1x128xf32>
    %c2 = arith.constant 2 : index
    %c0_4 = arith.constant 0 : index
    %3 = vector.load %arg2[%c2, %c0_4] : memref<7x128xf32, #tpu.memory_space<vmem>>, vector<1x128xf32>
    %c3 = arith.constant 3 : index
    %c0_5 = arith.constant 0 : index
    %4 = vector.load %arg2[%c3, %c0_5] : memref<7x128xf32, #tpu.memory_space<vmem>>, vector<1x128xf32>
    %c4 = arith.constant 4 : index
    %c0_6 = arith.constant 0 : index
    %5 = vector.load %arg2[%c4, %c0_6] : memref<7x128xf32, #tpu.memory_space<vmem>>, vector<1x128xf32>
    %c5 = arith.constant 5 : index
    %c0_7 = arith.constant 0 : index
    %6 = vector.load %arg2[%c5, %c0_7] : memref<7x128xf32, #tpu.memory_space<vmem>>, vector<1x128xf32>
    %c6 = arith.constant 6 : index
    %c0_8 = arith.constant 0 : index
    %7 = vector.load %arg2[%c6, %c0_8] : memref<7x128xf32, #tpu.memory_space<vmem>>, vector<1x128xf32>
    %c0_9 = arith.constant 0 : index
    %c0_10 = arith.constant 0 : index
    %8 = vector.load %arg3[%c0_9, %c0_10] : memref<2x128xf32, #tpu.memory_space<vmem>>, vector<1x128xf32>
    %c1_11 = arith.constant 1 : index
    %c0_12 = arith.constant 0 : index
    %9 = vector.load %arg3[%c1_11, %c0_12] : memref<2x128xf32, #tpu.memory_space<vmem>>, vector<1x128xf32>
    %10 = vector.broadcast %4 : vector<1x128xf32> to vector<8x128xf32>
    %11 = arith.mulf %0, %10 : vector<8x128xf32>
    %cst = arith.constant dense<0.000000e+00> : vector<8xf32>
    %12 = vector.multi_reduction <add>, %11, %cst [1] : vector<8x128xf32> to vector<8xf32>
    %13 = vector.shape_cast %12 : vector<8xf32> to vector<8x1xf32>
    %cst_13 = arith.constant 3.125000e-02 : f32
    %14 = vector.broadcast %cst_13 : f32 to vector<8x1xf32>
    %15 = arith.mulf %13, %14 : vector<8x1xf32>
    %16 = vector.broadcast %15 : vector<8x1xf32> to vector<8x128xf32>
    %17 = arith.subf %11, %16 : vector<8x128xf32>
    %18 = vector.broadcast %4 : vector<1x128xf32> to vector<8x128xf32>
    %19 = arith.mulf %17, %18 : vector<8x128xf32>
    %20 = arith.mulf %19, %19 : vector<8x128xf32>
    %cst_14 = arith.constant dense<0.000000e+00> : vector<8xf32>
    %21 = vector.multi_reduction <add>, %20, %cst_14 [1] : vector<8x128xf32> to vector<8xf32>
    %22 = vector.shape_cast %21 : vector<8xf32> to vector<8x1xf32>
    %cst_15 = arith.constant 3.125000e-02 : f32
    %23 = vector.broadcast %cst_15 : f32 to vector<8x1xf32>
    %24 = arith.mulf %22, %23 : vector<8x1xf32>
    %cst_16 = arith.constant 9.99999974E-6 : f32
    %25 = vector.broadcast %cst_16 : f32 to vector<8x1xf32>
    %26 = arith.addf %24, %25 : vector<8x1xf32>
    %27 = math.rsqrt %26 : vector<8x1xf32>
    %28 = vector.broadcast %27 : vector<8x1xf32> to vector<8x128xf32>
    %29 = arith.mulf %19, %28 : vector<8x128xf32>
    %30 = vector.broadcast %1 : vector<1x128xf32> to vector<8x128xf32>
    %31 = arith.mulf %29, %30 : vector<8x128xf32>
    %32 = vector.broadcast %2 : vector<1x128xf32> to vector<8x128xf32>
    %33 = arith.addf %31, %32 : vector<8x128xf32>
    %34 = vector.broadcast %3 : vector<1x128xf32> to vector<8x128xf32>
    %35 = arith.mulf %34, %33 : vector<8x128xf32>
    %cst_17 = arith.constant 5.000000e-01 : f32
    %36 = vector.broadcast %cst_17 : f32 to vector<8x128xf32>
    %37 = arith.mulf %36, %35 : vector<8x128xf32>
    %38 = math.tanh %37 : vector<8x128xf32>
    %cst_18 = arith.constant 5.000000e-01 : f32
    %39 = vector.broadcast %cst_18 : f32 to vector<8x128xf32>
    %40 = arith.mulf %39, %38 : vector<8x128xf32>
    %cst_19 = arith.constant 5.000000e-01 : f32
    %41 = vector.broadcast %cst_19 : f32 to vector<8x128xf32>
    %42 = arith.addf %40, %41 : vector<8x128xf32>
    %43 = arith.mulf %33, %42 : vector<8x128xf32>
    %44 = vector.broadcast %5 : vector<1x128xf32> to vector<8x128xf32>
    %45 = arith.mulf %0, %44 : vector<8x128xf32>
    %46 = arith.addf %43, %45 : vector<8x128xf32>
    %c0_20 = arith.constant 0 : index
    %c0_21 = arith.constant 0 : index
    %47 = vector.load %arg4[%c0_20, %c0_21] : memref<128x128xf32, #tpu.memory_space<vmem>>, vector<128x128xf32>
    %cst_22 = arith.constant dense<0.000000e+00> : vector<8x128xf32>
    %48 = tpu.matmul %46, %47, %cst_22 {dimension_numbers = #tpu.dot_dimension_numbers<[1], [0], [0], [1], [0, 0, 1, 1], [], []>} : vector<8x128xf32>, vector<128x128xf32>, vector<8x128xf32> -> vector<8x128xf32>
    %49 = vector.broadcast %9 : vector<1x128xf32> to vector<8x128xf32>
    %50 = arith.addf %48, %49 : vector<8x128xf32>
    %51 = vector.broadcast %8 : vector<1x128xf32> to vector<8x128xf32>
    %52 = arith.mulf %51, %50 : vector<8x128xf32>
    %cst_23 = arith.constant 5.000000e-01 : f32
    %53 = vector.broadcast %cst_23 : f32 to vector<8x128xf32>
    %54 = arith.mulf %53, %52 : vector<8x128xf32>
    %55 = math.tanh %54 : vector<8x128xf32>
    %cst_24 = arith.constant 5.000000e-01 : f32
    %56 = vector.broadcast %cst_24 : f32 to vector<8x128xf32>
    %57 = arith.mulf %56, %55 : vector<8x128xf32>
    %cst_25 = arith.constant 5.000000e-01 : f32
    %58 = vector.broadcast %cst_25 : f32 to vector<8x128xf32>
    %59 = arith.addf %57, %58 : vector<8x128xf32>
    %60 = arith.mulf %50, %59 : vector<8x128xf32>
    %c0_26 = arith.constant 0 : index
    %c0_27 = arith.constant 0 : index
    %61 = vector.load %arg5[%c0_26, %c0_27] : memref<128x128xf32, #tpu.memory_space<vmem>>, vector<128x128xf32>
    %cst_28 = arith.constant dense<0.000000e+00> : vector<8x128xf32>
    %62 = tpu.matmul %60, %61, %cst_28 {dimension_numbers = #tpu.dot_dimension_numbers<[1], [0], [0], [1], [0, 0, 1, 1], [], []>} : vector<8x128xf32>, vector<128x128xf32>, vector<8x128xf32> -> vector<8x128xf32>
    %63 = vector.broadcast %7 : vector<1x128xf32> to vector<8x128xf32>
    %64 = arith.addf %62, %63 : vector<8x128xf32>
    %65 = vector.broadcast %6 : vector<1x128xf32> to vector<8x128xf32>
    %66 = arith.mulf %65, %64 : vector<8x128xf32>
    %cst_29 = arith.constant 5.000000e-01 : f32
    %67 = vector.broadcast %cst_29 : f32 to vector<8x128xf32>
    %68 = arith.mulf %67, %66 : vector<8x128xf32>
    %69 = math.tanh %68 : vector<8x128xf32>
    %cst_30 = arith.constant 5.000000e-01 : f32
    %70 = vector.broadcast %cst_30 : f32 to vector<8x128xf32>
    %71 = arith.mulf %70, %69 : vector<8x128xf32>
    %cst_31 = arith.constant 5.000000e-01 : f32
    %72 = vector.broadcast %cst_31 : f32 to vector<8x128xf32>
    %73 = arith.addf %71, %72 : vector<8x128xf32>
    %74 = arith.mulf %64, %73 : vector<8x128xf32>
    %75 = arith.addf %74, %0 : vector<8x128xf32>
    %c0_32 = arith.constant 0 : index
    %c0_33 = arith.constant 0 : index
    %76 = vector.load %arg6[%c0_32, %c0_33] : memref<8x128xf32, #tpu.memory_space<vmem>>, vector<8x128xf32>
    tpu.vector_store %arg6[%c0_32, %c0_33], %75 {strides = array<i32>} : memref<8x128xf32, #tpu.memory_space<vmem>>, vector<8x128xf32>,
    return
  }
  func.func @transform_0(%arg0: i32) -> (i32, i32) {
    %c0_i32 = arith.constant 0 : i32
    %c0_i32_0 = arith.constant 0 : i32
    return %arg0, %c0_i32 : i32, i32
  }
  func.func @transform_1(%arg0: i32) -> (i32, i32) {
    %c0_i32 = arith.constant 0 : i32
    %c0_i32_0 = arith.constant 0 : i32
    %c0_i32_1 = arith.constant 0 : i32
    return %c0_i32, %c0_i32_0 : i32, i32
  }
  func.func @transform_2(%arg0: i32) -> (i32, i32) {
    %c0_i32 = arith.constant 0 : i32
    %c0_i32_0 = arith.constant 0 : i32
    %c0_i32_1 = arith.constant 0 : i32
    return %c0_i32, %c0_i32_0 : i32, i32
  }
  func.func @transform_3(%arg0: i32) -> (i32, i32) {
    %c0_i32 = arith.constant 0 : i32
    %c0_i32_0 = arith.constant 0 : i32
    %c0_i32_1 = arith.constant 0 : i32
    return %c0_i32, %c0_i32_0 : i32, i32
  }
  func.func @transform_4(%arg0: i32) -> (i32, i32) {
    %c0_i32 = arith.constant 0 : i32
    %c0_i32_0 = arith.constant 0 : i32
    %c0_i32_1 = arith.constant 0 : i32
    return %c0_i32, %c0_i32_0 : i32, i32
  }
  func.func @transform_5(%arg0: i32) -> (i32, i32) {
    %c0_i32 = arith.constant 0 : i32
    %c0_i32_0 = arith.constant 0 : i32
    return %arg0, %c0_i32 : i32, i32
  }
}

</mosaic_0001>

<bundles_post_ra>
// kernel: residual_block.1
= control target key start
LH: loop header
LB: loop body
LE: loop exit
PB: predicated region body
PF: predicated region fallthrough
CT: control target
= control target key end

     0   :  { %10 = vsyncpa [#allocation3], 0  ;;  %s1058_s0 = inlined_call_operand.vmem [shape: f32[16,128], index: 0, kind: input, shape index: {}]   ;;  %s1059_s1 = inlined_call_operand.vmem [shape: f32[7,128], index: 1, kind: input, shape index: {}]   ;;  %s1060_s2 = inlined_call_operand.vmem [shape: f32[2,128], index: 2, kind: input, shape index: {}]   ;;  %s1061_s3 = inlined_call_operand.hbm [shape: f32[128,128], index: 3, kind: input, shape index: {}]   ;;  %s1062_s4 = inlined_call_operand.hbm [shape: f32[128,128], index: 4, kind: input, shape index: {}]   ;;  %s1063_s5 = inlined_call_operand.vmem [shape: f32[16,128], index: 5, kind: output, shape index: {}]  }
   0x1   :  { %11 = vsyncpa [#allocation5], 0  ;;  %s905_s18 = smov 0  }
   0x2 LB: > { %s911_s19 = sadd.s32 4294967295, %s866_s18   ;;  %p582_p0 = scmp.ge.s32.totalorder %s866_s18, 1  ;;  %s866_s18 = sphi %s905_s18, %s17_s18  }
   0x3   : > { %p158_p1 = scmp.lt.s32.totalorder %s866_s18, 3  ;;  %s868_s20 = smov [#allocation2]  }
   0x4   : > { %s176_s21 = sshll.u32 %s868_s20, 4  ;;  %p1064_p3 = scmp.eq.s32.totalorder %s911_s19, 0  ;;  %s177_s21 = int_to_ptr.vmem [resolvable:$true] %s176_s21 }
   0x5   : > { %p915_p2 = pnand %p582_p0, %p158_p1  ;;  %s869_s23 = smov [#allocation4]  }
   0x6   : > { %s189_s24 = sshll.u32 %s869_s23, 4  ;;  %s796_s28 = scalar_lea.hbm %s1061_s3, 2048  ;;  %s928_s24 = int_to_ptr.vmem [resolvable:$true] %s189_s24 }
   0x7   : > { %s1066_s22 = scalar_select %p915_p2, 1, 0 }
   0x8   : > { %p762_p4 = pneg %p915_p2  ;;  %p797_p6 = scmp.ne.s32.totalorder %s1061_s3, %s796_s28 }
   0x9   : > { %p803_p10 = scmp.lt.u32.totalorder %s796_s28, %s1061_s3 }
   0xa   : > { %p924_p5 = pnand %p1064_p3, %p762_p4 }
   0xc   : > { %p798_p7 = pneg %p924_p5 }
   0xe   : > { %p799_p8 = pnand %p798_p7, %p797_p6 }
  0x10   : > { %p800_p9 = pneg %p799_p8 }
  0x12   : > { %p805_p11 = pnand %p803_p10, %p800_p9 }
  0x14   : > { %808 = shalt.err (!%p805_p11)
}
  0x15   : > { %s809_s8 = scalar_lea.vmem %s177_s21, 2048  ;;  %p817_p1 = scmp.lt.s32.totalorder %s177_s21, %s177_s21 }
  0x16   : > { %p810_p12 = scmp.ne.s32.totalorder %s177_s21, %s809_s8  ;;  %p818_p4 = scmp.lt.s32.totalorder %s809_s8, %s809_s8 }
  0x18   : > { %p812_p13 = pnand %p810_p12, %p798_p7  ;;  %p819_p3 = por %p818_p4, %p817_p1 }
  0x1a   : > { %p813_p0 = pneg %p812_p13 }
  0x1c   : > { %p820_p2 = pnand %p819_p3, %p813_p0 }
  0x1e   : > { %823 = shalt.err (!%p820_p2)
}
  0x1f   : > { %s870_s9 = smov 128   ;;  %s871_s10 = smov 8  }
  0x20   : > { %765 = dma.hbm_to_vmem [thread:$0]  (!%p924_p5), %s1061_s3, 2048, %s177_s21, [#allocation3], %s870_s9, %s870_s9, %s871_s10  }
  0x21   : > { %s824_s15 = scalar_lea.hbm %s1062_s4, 2048 }
  0x22   : > { %p825_p6 = scmp.ne.s32.totalorder %s1062_s4, %s824_s15  ;;  %p831_p8 = scmp.lt.u32.totalorder %s824_s15, %s1062_s4 }
  0x24   : > { %p827_p2 = pnand %p825_p6, %p798_p7 }
  0x26   : > { %p828_p3 = pneg %p827_p2 }
  0x28   : > { %p833_p9 = pnand %p831_p8, %p828_p3 }
  0x2a   : > { %836 = shalt.err (!%p833_p9)
}
  0x2b   : > { %s837_s21 = scalar_lea.vmem %s928_s24, 2048  ;;  %p845_p13 = scmp.lt.s32.totalorder %s928_s24, %s928_s24 }
  0x2c   : > { %p838_p10 = scmp.ne.s32.totalorder %s928_s24, %s837_s21  ;;  %p846_p0 = scmp.lt.s32.totalorder %s837_s21, %s837_s21 }
  0x2e   : > { %p840_p11 = pnand %p838_p10, %p798_p7  ;;  %p847_p1 = por %p846_p0, %p845_p13 }
  0x30   : > { %p841_p12 = pneg %p840_p11 }
  0x32   : > { %p848_p4 = pnand %p847_p1, %p841_p12 }
  0x34   : > { %851 = shalt.err (!%p848_p4)
}
  0x35   : > { %768 = dma.hbm_to_vmem [thread:$0]  (!%p924_p5), %s1062_s4, 2048, %s928_s24, [#allocation5], %s870_s9, %s870_s9, %s871_s10  }
  0x36   : > { %p1068_p6 = scmp.ne.s32.totalorder %s1066_s22, 0 }
  0x37   : > { %p1069_p2 = scmp.eq.s32.totalorder (!%p1068_p6), %s911_s19, 0 }
  0x38   : > { %212 = sbr.rel (%p1068_p6) target bundleno = 884 (0x374), region = 40 }
  0x3f   : > { %857 = dma.done.wait (%p1069_p2), [#allocation3], 2048   ;;  %p1070_p7 = pmov %p1069_p2 }
  0x40   : > { %p1071_p3 = pmov %p1069_p2 }
  0x41   : > { %859 = vsyncadd (%p1070_p7), [#allocation3], 4294965248 }
  0x42   : > { %861 = dma.done.wait (%p1071_p3), [#allocation5], 2048   ;;  %p1072_p8 = pmov %p1069_p2 }
  0x43   : > { %p242_p9 = scmp.lt.s32.totalorder %s911_s19, 1  ;;  %v591_v1 = vld [vmem:[%s1059_s1 + $0x3] ss:$0 sm:$0xff]  ;;  %v304_v9 = vld [vmem:[#allocation2 + $0x8] sm:$0xff]  ;;  %v872_v11 = vmov 0.0|0.0   ;;  %v305_v12 = vld [vmem:[#allocation2 + $0x10] sm:$0xff] }
  0x44   : > { %863 = vsyncadd (%p1072_p8), [#allocation5], 4294965248  ;;  %v303_v8 = vld [vmem:[#allocation2] sm:$0xff]  ;;  %706 = vmatprep.subr.bf16.mxu0 %v872_v11  ;;  %730 = vmatprep.subr.bf16.mxu1 %v872_v11  ;;  %v306_v13 = vld [vmem:[#allocation2 + $0x18] sm:$0xff]  ;;  %vm873_vm0 = vmmov 0   ;;  %v874_v17 = vmov 0.0  }
  0x45   : > { %s1074_s19 = smov (!%p242_p9, %s911_s19), 1  ;;  %v707_v10 = vpack.c.bf16 %v304_v9, %v303_v8  ;;  %v710_v14 = vpack.c.bf16 %v306_v13, %v305_v12  ;;  %v307_v15 = vld [vmem:[#allocation2 + $0x20] sm:$0xff]  ;;  %v308_v16 = vld [vmem:[#allocation2 + $0x28] sm:$0xff]  ;;  %668 = vmatprep.mubr.msk.f32.mxu0 %vm873_vm0, %v874_v17  ;;  %703 = vmatprep.mubr.msk.f32.mxu1 %vm873_vm0, %v874_v17  ;;  %v309_v19 = vld [vmem:[#allocation2 + $0x30] sm:$0xff] }
  0x46   : > { %s589_s22 = sshll.u32 %s1074_s19, 3  ;;  %v713_v18 = vpack.c.bf16 %v308_v16, %v307_v15  ;;  %v310_v20 = vld [vmem:[#allocation2 + $0x38] sm:$0xff]  ;;  %v311_v22 = vld [vmem:[#allocation2 + $0x40] sm:$0xff]  ;;  %v312_v23 = vld [vmem:[#allocation2 + $0x48] sm:$0xff] }
  0x47   : > { %s245_s28 = scalar_lea.vmem %s1058_s0, %s589_s22  ;;  %708 = vmatpush3.bf16.msra.mxu0 %v707_v10  ;;  %v716_v21 = vpack.c.bf16 %v310_v20, %v309_v19  ;;  %v719_v24 = vpack.c.bf16 %v312_v23, %v311_v22  ;;  %v313_v25 = vld [vmem:[#allocation2 + $0x50] sm:$0xff]  ;;  %v314_v26 = vld [vmem:[#allocation2 + $0x58] sm:$0xff]  ;;  %v315_v28 = vld [vmem:[#allocation2 + $0x60] sm:$0xff]  ;;  %s249_s25 = scalar_lea.vmem %s1063_s5, %s589_s22 }
  0x48   : > { %v997_v0 = vld [vmem:[%s245_s28] sm:$0xff]  ;;  %709 = vmatprep.subr.bf16.mxu0 %v872_v11  ;;  %v722_v27 = vpack.c.bf16 %v314_v26, %v313_v25  ;;  %v316_v29 = vld [vmem:[#allocation2 + $0x68] sm:$0xff]  ;;  %v317_v31 = vld [vmem:[#allocation2 + $0x70] sm:$0xff] }
  0x49   : > { %v264_v2 = vmul.f32 %v591_v1, %v997_v0  ;;  %v725_v30 = vpack.c.bf16 %v316_v29, %v315_v28  ;;  %v318_v32 = vld [vmem:[#allocation2 + $0x78] sm:$0xff]  ;;  %v403_v34 = vld [vmem:[#allocation4] sm:$0xff]  ;;  %v404_v35 = vld [vmem:[#allocation4 + $0x8] sm:$0xff] }
  0x4a   : > { %v728_v33 = vpack.c.bf16 %v318_v32, %v317_v31  ;;  %v405_v36 = vld [vmem:[#allocation4 + $0x10] sm:$0xff]  ;;  %v731_v37 = vpack.c.bf16 %v404_v35, %v403_v34  ;;  %v406_v38 = vld [vmem:[#allocation4 + $0x18] sm:$0xff]  ;;  %v592_v44 = vld [vmem:[%s1059_s1] ss:$0 sm:$0xff] }
  0x4b   : > { %265 = vadd.xlane.f32.xlu0 %v264_v2  ;;  %711 = vmatpush3.bf16.msra.mxu0 %v710_v14  ;;  %v734_v39 = vpack.c.bf16 %v406_v38, %v405_v36  ;;  %v593_v46 = vld [vmem:[%s1059_s1 + $0x1] ss:$0 sm:$0xff]  ;;  %v594_v48 = vld [vmem:[%s1059_s1 + $0x2] ss:$0 sm:$0xff]  ;;  %v595_v53 = vld [vmem:[%s1059_s1 + $0x4] ss:$0 sm:$0xff] }
  0x4c   : > { %712 = vmatprep.subr.bf16.mxu0 %v872_v11  ;;  %732 = vmatpush3.bf16.msra.mxu1 %v731_v37  ;;  %v301_v56 = vmul.f32 %v595_v53, %v997_v0  ;;  %v407_v59 = vld [vmem:[#allocation4 + $0x20] sm:$0xff]  ;;  %v408_v60 = vld [vmem:[#allocation4 + $0x28] sm:$0xff]  ;;  %v409_v62 = vld [vmem:[#allocation4 + $0x30] sm:$0xff] }
  0x4d   : > { %733 = vmatprep.subr.bf16.mxu1 %v872_v11  ;;  %v737_v61 = vpack.c.bf16 %v408_v60, %v407_v59  ;;  %v410_v63 = vld [vmem:[#allocation4 + $0x38] sm:$0xff]  ;;  %v415_v8 = vld [vmem:[#allocation4 + $0x60] sm:$0xff]  ;;  %v416_v9 = vld [vmem:[#allocation4 + $0x68] sm:$0xff] }
  0x4e   : > { %v749_v10 = vpack.c.bf16 %v416_v9, %v415_v8  ;;  %v417_v12 = vld [vmem:[#allocation4 + $0x70] sm:$0xff]  ;;  %v418_v13 = vld [vmem:[#allocation4 + $0x78] sm:$0xff]  ;;  %v596_v15 = vld [vmem:[%s1060_s2 + $0x1] ss:$0 sm:$0xff] }
  0x4f   : > { %714 = vmatpush3.bf16.msra.mxu0 %v713_v18  ;;  %v752_v14 = vpack.c.bf16 %v418_v13, %v417_v12  ;;  %v597_v16 = vld [vmem:[%s1060_s2] ss:$0 sm:$0xff]  ;;  %v598_v25 = vld [vmem:[%s1059_s1 + $0x6] ss:$0 sm:$0xff]  ;;  %v599_v26 = vld [vmem:[%s1059_s1 + $0x5] ss:$0 sm:$0xff] }
  0x50   : > { %715 = vmatprep.subr.bf16.mxu0 %v872_v11  ;;  %735 = vmatpush3.bf16.msra.mxu1 %v734_v39 }
  0x51   : > { %736 = vmatprep.subr.bf16.mxu1 %v872_v11 }
  0x53   : > { %717 = vmatpush3.bf16.msra.mxu0 %v716_v21 }
  0x54   : > { %718 = vmatprep.subr.bf16.mxu0 %v872_v11  ;;  %738 = vmatpush3.bf16.msra.mxu1 %v737_v61 }
  0x55   : > { %739 = vmatprep.subr.bf16.mxu1 %v872_v11 }
  0x57   : > { %720 = vmatpush3.bf16.msra.mxu0 %v719_v24 }
  0x58   : > { %721 = vmatprep.subr.bf16.mxu0 %v872_v11 }
  0x5b   : > { %723 = vmatpush3.bf16.msra.mxu0 %v722_v27 }
  0x5c   : > { %724 = vmatprep.subr.bf16.mxu0 %v872_v11 }
  0x5f   : > { %726 = vmatpush3.bf16.msra.mxu0 %v725_v30 }
  0x60   : > { %727 = vmatprep.subr.bf16.mxu0 %v872_v11 }
  0x63   : > { %729 = vmatpush3.bf16.msra.mxu0 %v728_v33 }
  0xd8   : > { %v266_v3 = vpop.xlane.xlu0 %265 }
  0xd9   : > { %v267_v4 = vmul.f32 0.03125, %v266_v3  ;;  %v412_v3 = vld [vmem:[#allocation4 + $0x48] sm:$0xff] }
  0xdb   : > { %v268_v5 = vsub.f32 %v264_v2, %v267_v4  ;;  %v411_v2 = vld [vmem:[#allocation4 + $0x40] sm:$0xff] }
  0xdc   : > { %v743_v4 = vpack.c.bf16 %v412_v3, %v411_v2 }
  0xdd   : > { %v1003_v6 = vmul.f32 %v591_v1, %v268_v5  ;;  %v740_v1 = vpack.c.bf16 %v410_v63, %v409_v62  ;;  %v413_v5 = vld [vmem:[#allocation4 + $0x50] sm:$0xff] }
  0xdf   : > { %v270_v7 = vmul.f32 %v1003_v6, %v1003_v6  ;;  %741 = vmatpush3.bf16.msra.mxu1 %v740_v1 }
  0xe0   : > { %742 = vmatprep.subr.bf16.mxu1 %v872_v11 }
  0xe1   : > { %271 = vadd.xlane.f32.xlu0 %v270_v7 }
  0xe3   : > { %744 = vmatpush3.bf16.msra.mxu1 %v743_v4 }
  0xe4   : > { %745 = vmatprep.subr.bf16.mxu1 %v872_v11 }
 0x16e   : > { %v272_v40 = vpop.xlane.xlu0 %271 }
 0x16f   : > { %v273_v41 = vmul.f32 0.03125, %v272_v40 }
 0x171   : > { %v274_v42 = vadd.f32 1e-05, %v273_v41 }
 0x173   : > { %788 = vrsqrt.f32 %v274_v42 }
 0x17d   : > { %v789_v43 = vpop.eup %788 }
 0x17e   : > { %v276_v45 = vmul.f32 %v789_v43, %v1003_v6  ;;  %v414_v6 = vld [vmem:[#allocation4 + $0x58] sm:$0xff] }
 0x17f   : > { %v746_v7 = vpack.c.bf16 %v414_v6, %v413_v5 }
 0x180   : > { %v281_v47 = vmul.f32 %v592_v44, %v276_v45 }
 0x181   : > { %747 = vmatpush3.bf16.msra.mxu1 %v746_v7 }
 0x182   : > { %v286_v49 = vadd.f32 %v593_v46, %v281_v47  ;;  %748 = vmatprep.subr.bf16.mxu1 %v872_v11 }
 0x184   : > { %v291_v50 = vmul.f32 %v594_v48, %v286_v49 }
 0x185   : > { %750 = vmatpush3.bf16.msra.mxu1 %v749_v10 }
 0x186   : > { %v292_v51 = vmul.f32 0.5, %v291_v50  ;;  %751 = vmatprep.subr.bf16.mxu1 %v872_v11 }
 0x188   : > { %790 = vtanh.f32 %v292_v51 }
 0x189   : > { %753 = vmatpush3.bf16.msra.mxu1 %v752_v14 }
 0x192   : > { %v791_v52 = vpop.eup %790 }
 0x193   : > { %v294_v54 = vmul.f32 0.5, %v791_v52 }
 0x195   : > { %v295_v55 = vadd.f32 0.5, %v294_v54 }
 0x197   : > { %v296_v57 = vmul.f32 %v295_v55, %v286_v49 }
 0x199   : > { %v302_v58 = vadd.f32 %v301_v56, %v296_v57 }
 0x19b   : > { %669 = vmatmul.mubr.f32.vlgmr.msra.gmra.mrb[0].mxu0 %v302_v58 }
 0x26e   : > { %v389_v17 = vpop.f32.mrb[0].mxu0 }
 0x26f   : > { %v390_v18 = vadd.f32 %v596_v15, %v389_v17  ;;  %v670_v19 = vpop.f32.mrb[1].mxu0 }
 0x271   : > { %v397_v20 = vmul.f32 %v597_v16, %v390_v18 }
 0x273   : > { %v398_v21 = vmul.f32 0.5, %v397_v20 }
 0x275   : > { %792 = vtanh.f32 %v398_v21 }
 0x27f   : > { %v793_v22 = vpop.eup %792 }
 0x280   : > { %v400_v11 = vmul.f32 0.5, %v793_v22 }
 0x282   : > { %v401_v23 = vadd.f32 0.5, %v400_v11 }
 0x284   : > { %v402_v24 = vmul.f32 %v401_v23, %v390_v18 }
 0x286   : > { %704 = vmatmul.mubr.f32.vlgmr.msra.gmra.mrb[0].mxu1 %v402_v24 }
 0x359   : > { %v489_v27 = vpop.f32.mrb[0].mxu1 }
 0x35a   : > { %v490_v28 = vadd.f32 %v598_v25, %v489_v27  ;;  %v705_v29 = vpop.f32.mrb[1].mxu1 }
 0x35c   : > { %v497_v30 = vmul.f32 %v599_v26, %v490_v28 }
 0x35e   : > { %v498_v31 = vmul.f32 0.5, %v497_v30 }
 0x360   : > { %794 = vtanh.f32 %v498_v31 }
 0x36a   : > { %v795_v32 = vpop.eup %794 }
 0x36b   : > { %v500_v33 = vmul.f32 0.5, %v795_v32 }
 0x36d   : > { %v501_v34 = vadd.f32 0.5, %v500_v33 }
 0x36f   : > { %v502_v35 = vmul.f32 %v501_v34, %v490_v28 }
 0x371   : > { %v503_v36 = vadd.f32 %v502_v35, %v997_v0 }
 0x373   : > { %504 = vst [vmem:[%s249_s25] sm:$0xff] %v503_v36 }
 0x374 PF: > { %s17_s18 = sadd.s32 1, %s866_s18  }
 0x375   : > { %p14_p5 = scmp.ge.s32.totalorder %s17_s18, 4  }
 0x377   :  { %16 = sbr.rel (!%p14_p5) target bundleno = 2 (0x2), region = 79 }
 0x37e   :  { %524 = vsyncpa [#allocation3], 1 }
 0x37f   :  { %526 = vsyncpa [#allocation3 + $0x1], 1 }
 0x380   :  { %527 = vsyncpa [#allocation5], 1 }

</bundles_post_ra>
